<compile_context>
chip_gen: v7x
topology: tpu7x:2x2x1
jax: 0.10.0
libtpu: 0.0.40
codegen_flags: <defaults>
</compile_context>

<pallas_src>
import functools

import jax
import jax.numpy as jnp
from jax import lax
from jax.experimental import pallas as pl
from jax.experimental.pallas import tpu as pltpu

_LANES = 128


def _round_up(x, m):
    return (x + m - 1) // m * m


def _pick_tile_h(Ho, Wo):
    """Largest divisor of Ho such that tile_h*Wo ~ 128 matmul rows."""
    target = max(1, 128 // max(Wo, 1))
    best = 1
    for d in range(1, Ho + 1):
        if Ho % d == 0 and d <= target:
            best = d
    return best


def _base_conv_kernel(x_ref, w_ref, shift_ref, o_ref, *, K, stride):
    """One grid step == (batch b, Cout tile, Ho tile).

    x_ref:     (1, Hp, Wp, Cin_p)        padded NHWC input, bf16
    w_ref:     (K*K*Cin_p, tile_co)      BN-scale-folded weights, bf16
    shift_ref: (1, tile_co)              BN shift, f32
    o_ref:     (1, tile_h, Wo, tile_co)  output tile
    """
    _, tile_h, Wo, tile_co = o_ref.shape
    Cin_p = x_ref.shape[3]
    rows_in = (tile_h - 1) * stride + K

    h = pl.program_id(2)
    row0 = pl.multiple_of(h * (tile_h * stride), tile_h * stride)
    band = x_ref[0, pl.ds(row0, rows_in), :, :]          # (rows_in, Wp, Cin_p)

    # im2col: gather the K*K taps along the lane axis -> one deep matmul.
    # TODO(synk): stride > 1 still uses strided in-kernel slices; a wrapper
    # space-to-depth would keep the loads fully contiguous.
    strides = None if stride == 1 else (stride, stride, 1)
    cols = []
    for kh in range(K):
        for kw in range(K):
            patch = lax.slice(
                band,
                (kh, kw, 0),
                (kh + (tile_h - 1) * stride + 1,
                 kw + (Wo - 1) * stride + 1,
                 Cin_p),
                strides)                                 # (tile_h, Wo, Cin_p)
            cols.append(patch)
    lhs = jnp.concatenate(cols, axis=-1)                 # (tile_h, Wo, K*K*Cin_p)
    lhs = lhs.reshape(tile_h * Wo, K * K * Cin_p)

    acc = jnp.dot(lhs, w_ref[...],
                  preferred_element_type=jnp.float32)    # (tile_h*Wo, tile_co)

    y = jnp.maximum(acc + shift_ref[...], 0.0)           # BN shift + ReLU (f32)
    o_ref[0] = y.reshape(tile_h, Wo, tile_co).astype(o_ref.dtype)


def base_conv(x_nchw, weight_oihw, gamma, beta, running_mean, running_var,
              *, stride: int = 1, groups: int = 1, eps: float = 1e-5,
              compute_dtype=jnp.bfloat16):
    """Pallas BaseConv.forward: Conv2d(no bias) + BatchNorm2d(eval) + ReLU.

    NCHW in / NCHW out to match the PyTorch module."""
    # TODO(synk): groups > 1 (the grouped / DWConv path) is not implemented.
    assert groups == 1, "only groups=1 supported"

    N, Cin, H, W = x_nchw.shape
    Cout, Cin_w, K, K2 = weight_oihw.shape
    assert Cin == Cin_w and K == K2
    pad = (K - 1) // 2
    Ho = (H + 2 * pad - K) // stride + 1
    Wo = (W + 2 * pad - K) // stride + 1
    Hp, Wp = H + 2 * pad, W + 2 * pad

    Cin_p = _round_up(Cin, _LANES)
    Cout_p = _round_up(Cout, _LANES)
    out_dtype = x_nchw.dtype

    # ---- glue (one fused XLA pass per tensor) ----------------------------
    scale = (gamma.astype(jnp.float32) /
             jnp.sqrt(running_var.astype(jnp.float32) + eps))
    shift = beta.astype(jnp.float32) - running_mean.astype(jnp.float32) * scale

    x_nhwc = jnp.transpose(x_nchw, (0, 2, 3, 1))
    x_p = jnp.pad(x_nhwc, ((0, 0), (pad, pad), (pad, pad), (0, Cin_p - Cin))
                  ).astype(compute_dtype)

    w = jnp.transpose(weight_oihw, (2, 3, 1, 0)).astype(jnp.float32)  # HWIO
    w = w * scale[None, None, None, :]                   # fold BN scale into w
    w = jnp.pad(w, ((0, 0), (0, 0), (0, Cin_p - Cin), (0, Cout_p - Cout)))
    w2d = w.reshape(K * K * Cin_p, Cout_p).astype(compute_dtype)

    shift_p = jnp.pad(shift, (0, Cout_p - Cout))[None, :]             # (1, Cout_p)

    # ---- tiling ----------------------------------------------------------
    tile_h = _pick_tile_h(Ho, Wo)
    if Cout_p <= 512:
        tile_co = Cout_p
    elif Cout_p % 256 == 0:
        tile_co = 256
    else:
        tile_co = _LANES
    grid = (N, Cout_p // tile_co, Ho // tile_h)

    # VMEM budget: double-buffered blocks + im2col intermediate + headroom,
    # clamped to v7x's 64 MiB physical VMEM.
    csize = jnp.dtype(compute_dtype).itemsize
    osize = jnp.dtype(out_dtype).itemsize
    in_blk = Hp * Wp * Cin_p * csize
    w_blk = K * K * Cin_p * tile_co * csize
    out_blk = tile_h * Wo * tile_co * osize
    im2col = tile_h * Wo * K * K * Cin_p * csize + tile_h * Wo * tile_co * 4
    vmem_bytes = int(min(max(3 * (in_blk + w_blk + out_blk + im2col) + (2 << 20),
                             16 * 2**20),
                         64 * 2**20))

    cost = pl.CostEstimate(
        flops=2 * N * Ho * Wo * K * K * Cin_p * Cout_p,
        transcendentals=0,
        bytes_accessed=int(x_p.size * csize + w2d.size * csize
                           + shift_p.size * 4 + N * Ho * Wo * Cout_p * osize))

    kernel = functools.partial(_base_conv_kernel, K=K, stride=stride)

    out_nhwc = pl.pallas_call(
        kernel,
        out_shape=jax.ShapeDtypeStruct((N, Ho, Wo, Cout_p), out_dtype),
        grid=grid,
        in_specs=[
            pl.BlockSpec((1, Hp, Wp, Cin_p), lambda b, co, h: (b, 0, 0, 0)),
            pl.BlockSpec((K * K * Cin_p, tile_co), lambda b, co, h: (0, co)),
            pl.BlockSpec((1, tile_co), lambda b, co, h: (0, co)),
        ],
        out_specs=pl.BlockSpec((1, tile_h, Wo, tile_co),
                               lambda b, co, h: (b, h, 0, co)),
        compiler_params=pltpu.CompilerParams(
            dimension_semantics=("parallel", "parallel", "parallel"),
            vmem_limit_bytes=vmem_bytes),
        cost_estimate=cost,
    )(x_p, w2d, shift_p)
    # TODO(synk): for very large H*W the per-batch input block should be
    # row-tiled with a K-1 halo (Element-indexed BlockSpec / manual DMA)
    # instead of holding the full padded image in VMEM.

    out = out_nhwc[..., :Cout]                           # drop lane padding
    return jnp.transpose(out, (0, 3, 1, 2))              # back to NCHW


def _reference(x_nchw, weight_oihw, gamma, beta, running_mean, running_var,
               *, stride=1, eps=1e-5):
    """Pure-JAX f32 reference matching the PyTorch module semantics."""
    pad = (weight_oihw.shape[2] - 1) // 2
    y = lax.conv_general_dilated(
        x_nchw.astype(jnp.float32), weight_oihw.astype(jnp.float32),
        window_strides=(stride, stride),
        padding=((pad, pad), (pad, pad)),
        dimension_numbers=("NCHW", "OIHW", "NCHW"))
    scale = gamma / jnp.sqrt(running_var + eps)
    shift = beta - running_mean * scale
    y = y * scale[None, :, None, None] + shift[None, :, None, None]
    return jnp.maximum(y, 0.0)


if __name__ == "__main__":
    # Small shapes consistent with the module: batch=2, Cin=4, Cout=8,
    # kernel_size=3, stride=1, H=W=16.
    N, Cin, Cout, K, H, W = 2, 4, 8, 3, 16, 16
    stride = 1

    key = jax.random.PRNGKey(0)
    kx, kw = jax.random.split(key)

    x = jax.random.normal(kx, (N, Cin, H, W), dtype=jnp.float32)

    fan_in = Cin * K * K
    bound = 1.0 / jnp.sqrt(fan_in)
    weight = jax.random.uniform(kw, (Cout, Cin, K, K), dtype=jnp.float32,
                                minval=-bound, maxval=bound)

    gamma = 1.0 + 0.1 * jnp.arange(Cout, dtype=jnp.float32)
    beta = 0.05 * jnp.arange(Cout, dtype=jnp.float32)
    running_mean = 0.02 * jnp.arange(Cout, dtype=jnp.float32)
    running_var = 1.0 + 0.03 * jnp.arange(Cout, dtype=jnp.float32)

    out = base_conv(x, weight, gamma, beta, running_mean, running_var,
                    stride=stride)
    out = jax.block_until_ready(out)

    ref = _reference(x, weight, gamma, beta, running_mean, running_var,
                     stride=stride)
    assert out.shape == (N, Cout, H, W)
    # Kernel feeds the MXU in bf16 (by design, per perf review), so compare
    # against the f32 reference with bf16-level tolerance.
    assert jnp.allclose(out, ref, atol=3e-2, rtol=3e-2), (
        float(jnp.max(jnp.abs(out - ref))))

    print("KERNEL_OK")
</pallas_src>

<mosaic_0001>
module attributes {stable_mosaic.version = 11 : i64} {
  func.func @_base_conv_kernel(%arg0: i32, %arg1: i32, %arg2: i32, %arg3: memref<1x18x18x128xbf16, #tpu.memory_space<vmem>>, %arg4: memref<1152x128xbf16, #tpu.memory_space<vmem>>, %arg5: memref<1x128xf32, #tpu.memory_space<vmem>>, %arg6: memref<1x8x16x128xf32, #tpu.memory_space<vmem>>) attributes {dimension_semantics = [#tpu.dimension_semantics<parallel>, #tpu.dimension_semantics<parallel>, #tpu.dimension_semantics<parallel>], iteration_bounds = array<i64: 2, 1, 2>, scalar_prefetch = 0 : i64, scratch_operands = 0 : i64, tpu.core_type = #tpu.core_type<tc>, window_params = [{transform_indices = @transform_0, window_bounds = array<i64: 1, 18, 18, 128>}, {transform_indices = @transform_1, window_bounds = array<i64: 1152, 128>}, {transform_indices = @transform_2, window_bounds = array<i64: 1, 128>}, {transform_indices = @transform_3, window_bounds = array<i64: 1, 8, 16, 128>}]} {
    %c8_i32 = arith.constant 8 : i32
    %0 = arith.muli %arg2, %c8_i32 : i32
    %1 = tpu.assume_multiple %0, 8 : i32
    %c0 = arith.constant 0 : index
    %2 = arith.index_cast %1 : i32 to index
    %c0_0 = arith.constant 0 : index
    %c0_1 = arith.constant 0 : index
    %3 = vector.load %arg3[%c0, %2, %c0_0, %c0_1] : memref<1x18x18x128xbf16, #tpu.memory_space<vmem>>, vector<1x10x18x128xbf16>
    %4 = vector.shape_cast %3 : vector<1x10x18x128xbf16> to vector<10x18x128xbf16>
    %5 = vector.extract_strided_slice %4 {offsets = [0, 0, 0], sizes = [8, 16, 128], strides = [1, 1, 1]} : vector<10x18x128xbf16> to vector<8x16x128xbf16>
    %6 = vector.extract_strided_slice %4 {offsets = [0, 1, 0], sizes = [8, 16, 128], strides = [1, 1, 1]} : vector<10x18x128xbf16> to vector<8x16x128xbf16>
    %7 = vector.extract_strided_slice %4 {offsets = [0, 2, 0], sizes = [8, 16, 128], strides = [1, 1, 1]} : vector<10x18x128xbf16> to vector<8x16x128xbf16>
    %8 = vector.extract_strided_slice %4 {offsets = [1, 0, 0], sizes = [8, 16, 128], strides = [1, 1, 1]} : vector<10x18x128xbf16> to vector<8x16x128xbf16>
    %9 = vector.extract_strided_slice %4 {offsets = [1, 1, 0], sizes = [8, 16, 128], strides = [1, 1, 1]} : vector<10x18x128xbf16> to vector<8x16x128xbf16>
    %10 = vector.extract_strided_slice %4 {offsets = [1, 2, 0], sizes = [8, 16, 128], strides = [1, 1, 1]} : vector<10x18x128xbf16> to vector<8x16x128xbf16>
    %11 = vector.extract_strided_slice %4 {offsets = [2, 0, 0], sizes = [8, 16, 128], strides = [1, 1, 1]} : vector<10x18x128xbf16> to vector<8x16x128xbf16>
    %12 = vector.extract_strided_slice %4 {offsets = [2, 1, 0], sizes = [8, 16, 128], strides = [1, 1, 1]} : vector<10x18x128xbf16> to vector<8x16x128xbf16>
    %13 = vector.extract_strided_slice %4 {offsets = [2, 2, 0], sizes = [8, 16, 128], strides = [1, 1, 1]} : vector<10x18x128xbf16> to vector<8x16x128xbf16>
    %14 = tpu.concatenate %5, %6, %7, %8, %9, %10, %11, %12, %13 in 2 : vector<8x16x128xbf16>, vector<8x16x128xbf16>, vector<8x16x128xbf16>, vector<8x16x128xbf16>, vector<8x16x128xbf16>, vector<8x16x128xbf16>, vector<8x16x128xbf16>, vector<8x16x128xbf16>, vector<8x16x128xbf16> -> vector<8x16x1152xbf16>
    %15 = vector.shape_cast %14 : vector<8x16x1152xbf16> to vector<128x1152xbf16>
    %c0_2 = arith.constant 0 : index
    %c0_3 = arith.constant 0 : index
    %16 = vector.load %arg4[%c0_2, %c0_3] : memref<1152x128xbf16, #tpu.memory_space<vmem>>, vector<1152x128xbf16>
    %cst = arith.constant dense<0.000000e+00> : vector<128x128xf32>
    %17 = tpu.matmul %15, %16, %cst {dimension_numbers = #tpu.dot_dimension_numbers<[1], [0], [0], [1], [0, 0, 1, 1], [], []>} : vector<128x1152xbf16>, vector<1152x128xbf16>, vector<128x128xf32> -> vector<128x128xf32>
    %c0_4 = arith.constant 0 : index
    %c0_5 = arith.constant 0 : index
    %18 = vector.load %arg5[%c0_4, %c0_5] : memref<1x128xf32, #tpu.memory_space<vmem>>, vector<1x128xf32>
    %19 = vector.broadcast %18 : vector<1x128xf32> to vector<128x128xf32>
    %20 = arith.addf %17, %19 : vector<128x128xf32>
    %cst_6 = arith.constant 0.000000e+00 : f32
    %21 = vector.broadcast %cst_6 : f32 to vector<128x128xf32>
    %22 = arith.maximumf %20, %21 : vector<128x128xf32>
    %23 = vector.shape_cast %22 : vector<128x128xf32> to vector<8x16x128xf32>
    %c0_7 = arith.constant 0 : index
    %c0_8 = arith.constant 0 : index
    %c0_9 = arith.constant 0 : index
    %c0_10 = arith.constant 0 : index
    %24 = vector.load %arg6[%c0_7, %c0_8, %c0_9, %c0_10] : memref<1x8x16x128xf32, #tpu.memory_space<vmem>>, vector<1x8x16x128xf32>
    %25 = vector.shape_cast %24 : vector<1x8x16x128xf32> to vector<8x16x128xf32>
    %26 = vector.shape_cast %23 : vector<8x16x128xf32> to vector<1x8x16x128xf32>
    tpu.vector_store %arg6[%c0_7, %c0_8, %c0_9, %c0_10], %26 {strides = array<i32>} : memref<1x8x16x128xf32, #tpu.memory_space<vmem>>, vector<1x8x16x128xf32>,
    return
  }
  func.func @transform_0(%arg0: i32, %arg1: i32, %arg2: i32) -> (i32, i32, i32, i32) {
    %c0_i32 = arith.constant 0 : i32
    %c0_i32_0 = arith.constant 0 : i32
    %c0_i32_1 = arith.constant 0 : i32
    %c0_i32_2 = arith.constant 0 : i32
    return %arg0, %c0_i32, %c0_i32_0, %c0_i32_1 : i32, i32, i32, i32
  }
  func.func @transform_1(%arg0: i32, %arg1: i32, %arg2: i32) -> (i32, i32) {
    %c0_i32 = arith.constant 0 : i32
    %c0_i32_0 = arith.constant 0 : i32
    return %c0_i32, %arg1 : i32, i32
  }
  func.func @transform_2(%arg0: i32, %arg1: i32, %arg2: i32) -> (i32, i32) {
    %c0_i32 = arith.constant 0 : i32
    %c0_i32_0 = arith.constant 0 : i32
    return %c0_i32, %arg1 : i32, i32
  }
  func.func @transform_3(%arg0: i32, %arg1: i32, %arg2: i32) -> (i32, i32, i32, i32) {
    %c0_i32 = arith.constant 0 : i32
    %c0_i32_0 = arith.constant 0 : i32
    return %arg0, %arg2, %c0_i32, %arg1 : i32, i32, i32, i32
  }
}

</mosaic_0001>

<bundles_post_ra>
// kernel: tpu_custom_call.1
= control target key start
LH: loop header
LB: loop body
LE: loop exit
PB: predicated region body
PF: predicated region fallthrough
CT: control target
= control target key end

     0   :  { %8 = vsyncpa [#allocation3], 0  ;;  %s3120_s0 = inlined_call_operand.vmem [shape: bf16[2,18,18,128], index: 0, kind: input, shape index: {}]   ;;  %s3121_s1 = inlined_call_operand.vmem [shape: bf16[1152,128], index: 1, kind: input, shape index: {}]   ;;  %s3122_s2 = inlined_call_operand.vmem [shape: f32[1,128], index: 2, kind: input, shape index: {}]   ;;  %s3123_s3 = inlined_call_operand.hbm [shape: f32[2,16,16,128], index: 3, kind: output, shape index: {}]  }
   0x1   :  { %10 = vsyncpa [#allocation3 + $0x1], 0  ;;  %s2467_s12 = smov 0   ;;  %s2469_s13 = smov 0  }
   0x2   :  { %s2471_s14 = smov 0   ;;  %s2473_s15 = smov 0  }
   0x3   :  { %s2475_s16 = smov 0   ;;  %s2477_s17 = smov 0  }
   0x4   :  { %s2479_s18 = smov 0   ;;  %s2481_s19 = smov 0  }
   0x5 LB: > { %s1748_s20 = sadd.s32 4294967295, %s2442_s19   ;;  %s1749_s21 = sadd.s32 4294967294, %s2442_s19   ;;  %s2442_s19 = sphi %s2481_s19, %s16_s19   ;;  %s2438_s18 = sphi %s2479_s18, %s3132_s18   ;;  %s2434_s17 = sphi %s2477_s17, %s3131_s17   ;;  %s2430_s16 = sphi %s2475_s16, %s3130_s16   ;;  %s2426_s15 = sphi %s2473_s15, %s3129_s15   ;;  %s2422_s14 = sphi %s2471_s14, %s3128_s14   ;;  %s2418_s13 = sphi %s2469_s13, %s3127_s13   ;;  %s2414_s12 = sphi %s2467_s12, %s3126_s12  }
   0x6   : > { %s28_s22 = sadd.s32 1, %s2434_s17  ;;  %s35_s23 = sadd.s32 1, %s2438_s18 }
   0x7   : > { %p29_p0 = scmp.ge.s32.totalorder %s28_s22, 2  ;;  %p134_p1 = scmp.ne.s32.totalorder %s2422_s14, %s2418_s13 }
   0x8   : > { %p135_p2 = scmp.eq.s32.totalorder %s1748_s20, 3  ;;  %p140_p5 = scmp.ne.s32.totalorder %s2418_s13, %s2414_s12 }
   0x9   : > { %s3134_s22 = smov (%p29_p0, %s28_s22), 0  ;;  %s3136_s23 = smov (!%p29_p0, %s35_s23), %s2438_s18 }
   0xa   : > { %s118_s24 = ssub.s32 %s2434_s17, %s3134_s22  ;;  %p2518_p3 = por %p135_p2, %p134_p1 }
   0xb   : > { %p37_p4 = scmp.ge.s32.totalorder %s3136_s23, 2  ;;  %p141_p6 = scmp.eq.s32.totalorder %s1749_s21, 3 }
   0xc   : > { %p1754_p7 = scmp.ge.s32.totalorder %s2442_s19, 1  ;;  %p180_p9 = scmp.lt.s32.totalorder %s2442_s19, 5 }
   0xd   : > { %s3138_s23 = smov (%p37_p4, %s3136_s23), 0  ;;  %p2527_p8 = por %p141_p6, %p140_p5 }
   0xe   : > { %s117_s27 = ssub.s32 %s2438_s18, %s3138_s23  ;;  %s124_s28 = sadd.s32 1, %s2422_s14 }
   0xf   : > { %s119_s29 = sor.u32 %s118_s24, %s117_s27  ;;  %p181_p10 = pnand %p1754_p7, %p180_p9 }
  0x10   : > { %p122_p11 = scmp.eq.s32.totalorder %s119_s29, 0  ;;  %v2256_v0 = vld [vmem:[%s3121_s1 + $0x40] sm:$0xff] (!%p181_p10)   ;;  %v2260_v4 = vld [vmem:[%s3121_s1 + $0x48] sm:$0xff] (!%p181_p10)   ;;  %v2264_v8 = vld [vmem:[%s3121_s1 + $0x50] sm:$0xff] (!%p181_p10)   ;;  %p211_p12 = scmp.lt.s32.totalorder (!%p181_p10), %s2430_s16, 1  ;;  %vm436_vm1 = vcmask (!%p181_p10), 1046528  }
  0x11   : > { %184 = sbr.rel (%p181_p10) target bundleno = 422 (0x1a6), region = 32  ;;  %v2257_v1 = vld [vmem:[%s3121_s1 + $0xc0] sm:$0xff] (!%p181_p10)   ;;  %1862 = vmatprep.subr.bf16.mxu0 (!%p181_p10), %v2256_v0  ;;  %v2261_v5 = vld [vmem:[%s3121_s1 + $0xc8] sm:$0xff] (!%p181_p10)   ;;  %v2265_v9 = vld [vmem:[%s3121_s1 + $0xd0] sm:$0xff] (!%p181_p10)   ;;  %vm331_vm0 = vsmask.f32 (!%p181_p10), 7424 }
  0x12   : > { %s2536_s30 = scalar_select %p122_p11, %s2422_s14, %s124_s28  }
  0x13   : > { %v2258_v2 = vld [vmem:[%s3121_s1] sm:$0xff] (!%p181_p10)   ;;  %1926 = vmatprep.subr.bf16.mxu1 (!%p181_p10), %v2257_v1  ;;  %v2262_v6 = vld [vmem:[%s3121_s1 + $0x8] sm:$0xff] (!%p181_p10)   ;;  %v2266_v10 = vld [vmem:[%s3121_s1 + $0x10] sm:$0xff] (!%p181_p10)   ;;  %s1860_s5 = smul.u32 (!%p181_p10), 96, %s2426_s15  ;;  %s1861_s10 = sshll.u32 (!%p181_p10), %s2426_s15, 4 }
  0x14   : > { %v2259_v3 = vld [vmem:[%s3121_s1 + $0x80] sm:$0xff] (!%p181_p10)   ;;  %1863 = vmatpush3.bf16.msra.mxu0 (!%p181_p10), %v2258_v2  ;;  %v2263_v7 = vld [vmem:[%s3121_s1 + $0x88] sm:$0xff] (!%p181_p10)   ;;  %v2267_v11 = vld [vmem:[%s3121_s1 + $0x90] sm:$0xff] (!%p181_p10)   ;;  %s1856_s20 = sshll.u32 (!%p181_p10), %s2430_s16, 5 }
  0x15   : > { %1927 = vmatpush3.bf16.msra.mxu1 (!%p181_p10), %v2259_v3  ;;  %1864 = vmatprep.subr.bf16.mxu0 (!%p181_p10), %v2260_v4  ;;  %v2268_v12 = vld [vmem:[%s3121_s1 + $0x58] sm:$0xff] (!%p181_p10)   ;;  %v2272_v16 = vld [vmem:[%s3121_s1 + $0x60] sm:$0xff] (!%p181_p10)   ;;  %v2276_v20 = vld [vmem:[%s3121_s1 + $0x68] sm:$0xff] (!%p181_p10)   ;;  %s1636_s21 = sadd.s32 (!%p181_p10), %s1861_s10, %s1856_s20 }
  0x16   : > { %1928 = vmatprep.subr.bf16.mxu1 (!%p181_p10), %v2261_v5  ;;  %v2269_v13 = vld [vmem:[%s3121_s1 + $0xd8] sm:$0xff] (!%p181_p10)   ;;  %v2273_v17 = vld [vmem:[%s3121_s1 + $0xe0] sm:$0xff] (!%p181_p10)   ;;  %v2277_v21 = vld [vmem:[%s3121_s1 + $0xe8] sm:$0xff] (!%p181_p10)   ;;  %s1857_s15 = sshll.u32 (!%p181_p10), %s1636_s21, 7 }
  0x17   : > { %v2270_v14 = vld [vmem:[%s3121_s1 + $0x18] sm:$0xff] (!%p181_p10)   ;;  %v2274_v18 = vld [vmem:[%s3121_s1 + $0x20] sm:$0xff] (!%p181_p10)   ;;  %v2278_v22 = vld [vmem:[%s3121_s1 + $0x28] sm:$0xff] (!%p181_p10)   ;;  %s3059_s29 = scalar_lea.hbm (!%p181_p10), %s3123_s3, %s1857_s15 }
  0x18   : > { %1865 = vmatpush3.bf16.msra.mxu0 %v2262_v6  ;;  %v2271_v15 = vld [vmem:[%s3121_s1 + $0x98] sm:$0xff]   ;;  %v2275_v19 = vld [vmem:[%s3121_s1 + $0xa0] sm:$0xff]   ;;  %s212_s28 = scalar_select %p211_p12, %s2430_s16, 1  ;;  %v2279_v23 = vld [vmem:[%s3121_s1 + $0xa8] sm:$0xff]  }
  0x19   : > { %1929 = vmatpush3.bf16.msra.mxu1 %v2263_v7  ;;  %1866 = vmatprep.subr.bf16.mxu0 %v2264_v8  ;;  %v2280_v24 = vld [vmem:[%s3121_s1 + $0x70] sm:$0xff]   ;;  %v2284_v28 = vld [vmem:[%s3121_s1 + $0x78] sm:$0xff]   ;;  %v2291_v40 = vld [vmem:[%s3121_s1 + $0x140] sm:$0xff]  }
  0x1a   : > { %1930 = vmatprep.subr.bf16.mxu1 %v2265_v9  ;;  %s2182_s11 = smul.u32 216, %s212_s28  ;;  %v2281_v25 = vld [vmem:[%s3121_s1 + $0xf0] sm:$0xff]   ;;  %v2285_v29 = vld [vmem:[%s3121_s1 + $0xf8] sm:$0xff]   ;;  %v2292_v43 = vld [vmem:[%s3121_s1 + $0x1c0] sm:$0xff]   ;;  %s208_s28 = sand.u32 1, %s2418_s13  }
  0x1b   : > { %v2282_v26 = vld [vmem:[%s3121_s1 + $0x30] sm:$0xff]   ;;  %v2286_v30 = vld [vmem:[%s3121_s1 + $0x38] sm:$0xff]   ;;  %v2293_v45 = vld [vmem:[%s3121_s1 + $0x100] sm:$0xff]   ;;  %s1755_s8 = sshll.u32 %s208_s28, 7 }
  0x1c   : > { %1867 = vmatpush3.bf16.msra.mxu0 %v2266_v10  ;;  %v2283_v27 = vld [vmem:[%s3121_s1 + $0xb0] sm:$0xff]   ;;  %s215_s9 = scalar_lea.vmem %s3120_s0, %s2182_s11  ;;  %v2287_v31 = vld [vmem:[%s3121_s1 + $0xb8] sm:$0xff]   ;;  %v2294_v47 = vld [vmem:[%s3121_s1 + $0x180] sm:$0xff]   ;;  %s3068_s11 = scalar_lea.sflag [#allocation3], %s208_s28 }
  0x1d   : > { %1931 = vmatpush3.bf16.msra.mxu1 %v2267_v11  ;;  %1868 = vmatprep.subr.bf16.mxu0 %v2268_v12  ;;  %s2637_s4 = scalar_lea.vmem %s215_s9, %s1860_s5  ;;  %v2297_v57 = vld [vmem:[%s3121_s1 + $0x148] sm:$0xff]   ;;  %v2303_v10 = vld [vmem:[%s3121_s1 + $0x150] sm:$0xff]   ;;  %s3031_s9 = scalar_lea.vmem [#allocation2], %s1755_s8 }
  0x1e   : > { %1932 = vmatprep.subr.bf16.mxu1 %v2269_v13  ;;  %v2288_v32 = vld [vmem:[%s2637_s4] sm:$0xff]   ;;  %v2289_v33 = vld [vmem:[%s2637_s4 + $0x8] ss:$0 sps:$4 sm:$0x11]   ;;  %v2290_v34 = vld [vmem:[%s2637_s4 + $0xc] sm:$0xff]   ;;  %s1639_s16 = sshll.u32 %s3031_s9, 4  ;;  %s3061_s16 = int_to_ptr.vmem [resolvable:$true] %s1639_s16 }
  0x1f   : > { %v333_v35 = vshrl.u32 %v2288_v32, 16  ;;  %v335_v36 = vshll.u32 %v2288_v32, 16  ;;  %v340_v37 = vshll.u32 %v2289_v33, 16  ;;  %v437_v38 = vrot.slane %v2288_v32, 1  ;;  %1233 = vmatprep.mubr.bf16.mxu1 %v2290_v34  ;;  %v2661_v52 = vld [vmem:[%s2637_s4 + $0x18] sm:$0xff]   ;;  %v2298_v58 = vld [vmem:[%s3121_s1 + $0x1c8] sm:$0xff]  }
  0x20   : > { %1869 = vmatpush3.bf16.msra.mxu0 %v2270_v14  ;;  %v438_v39 = vrot.slane %v2289_v33, 1  ;;  %v345_v48 = vshrl.u32 %v2290_v34, 16  ;;  %v2295_v49 = vld [vmem:[%s2637_s4 + $0x14] ss:$0 sps:$4 sm:$0x11]   ;;  %v347_v50 = vshll.u32 %v2290_v34, 16 }
  0x21   : > { %1933 = vmatpush3.bf16.msra.mxu1 %v2271_v15  ;;  %1870 = vmatprep.subr.bf16.mxu0 %v2272_v16  ;;  %v337_v41 = vrot.slane %v335_v36, 1  ;;  %v342_v42 = vrot.slane %v340_v37, 1  ;;  %v440_v53 = vrot.slane %v2290_v34, 1  ;;  %v352_v55 = vshll.u32 %v2295_v49, 16  ;;  %v2299_v63 = vld [vmem:[%s3121_s1 + $0x108] sm:$0xff]   ;;  %v2304_v13 = vld [vmem:[%s3121_s1 + $0x1d0] sm:$0xff]  }
  0x22   : > { %1934 = vmatprep.subr.bf16.mxu1 %v2273_v17  ;;  %v439_v44 = vsel %vm436_vm1, %v437_v38, %v438_v39  ;;  %v349_v54 = vrot.slane %v347_v50, 1  ;;  %v441_v56 = vrot.slane %v2295_v49, 1  ;;  %v357_v59 = vshrl.u32 %v2661_v52, 16  ;;  %v2300_v0 = vld [vmem:[%s3121_s1 + $0x188] sm:$0xff]   ;;  %v2305_v14 = vld [vmem:[%s3121_s1 + $0x110] sm:$0xff]   ;;  %s2348_s6 = scalar_lea.vmem %s3061_s16, 2048 }
  0x23   : > { %v338_v46 = vor.u32 %v337_v41, %v333_v35  ;;  %v354_v61 = vrot.slane %v352_v55, 1  ;;  %v359_v1 = vshll.u32 %v2661_v52, 16  ;;  %v2301_v3 = vld [vmem:[%s2637_s4 + $0x20] ss:$0 sps:$4 sm:$0x11]   ;;  %v2686_v4 = vld [vmem:[%s2637_s4 + $0x24] sm:$0xff]   ;;  %p2349_p13 = scmp.ne.s32.totalorder %s3061_s16, %s2348_s6 }
  0x24   : > { %1871 = vmatpush3.bf16.msra.mxu0 %v2274_v18  ;;  %v350_v60 = vor.u32 %v349_v54, %v345_v48  ;;  %v2672_v62 = vsel %vm436_vm1, %v440_v53, %v441_v56  ;;  %v443_v6 = vrot.slane %v2661_v52, 1  ;;  %v364_v7 = vshll.u32 %v2301_v3, 16  ;;  %v2306_v18 = vld [vmem:[%s3121_s1 + $0x190] sm:$0xff]   ;;  %v2313_v33 = vld [vmem:[%s2637_s4 + $0x38] ss:$0 sps:$4 sm:$0x11]  }
  0x25   : > { %1935 = vmatpush3.bf16.msra.mxu1 %v2275_v19  ;;  %1872 = vmatprep.subr.bf16.mxu0 %v2276_v20  ;;  %v343_v51 = vsel %vm331_vm0, %v338_v46, %v342_v42  ;;  %v361_v5 = vrot.slane %v359_v1, 1  ;;  %v444_v8 = vrot.slane %v2301_v3, 1  ;;  %v369_v11 = vshrl.u32 %v2686_v4, 16  ;;  %v2307_v19 = vld [vmem:[%s2637_s4 + $0x2c] ss:$0 sps:$4 sm:$0x11]   ;;  %p2350_p0 = pnand %p2349_p13, %p2518_p3 }
  0x26   : > { %1936 = vmatprep.subr.bf16.mxu1 %v2277_v21  ;;  %1136 = vmatprep.mubr.bf16.mxu0 %v343_v51  ;;  %v2682_v2 = vsel %vm331_vm0, %v350_v60, %v354_v61  ;;  %v366_v12 = vrot.slane %v364_v7, 1  ;;  %v371_v15 = vshll.u32 %v2686_v4, 16  ;;  %v2715_v21 = vld [vmem:[%s2637_s4 + $0x30] sm:$0xff]   ;;  %v2740_v35 = vld [vmem:[%s2637_s4 + $0x3c] sm:$0xff]   ;;  %v388_v37 = vshll.u32 %v2313_v33, 16  ;;  %v2768_v53 = vld [vmem:[%s2637_s4 + $0x48] sm:$0xff]  }
  0x27   : > { %v362_v9 = vor.u32 %v361_v5, %v357_v59  ;;  %v2707_v17 = vsel %vm436_vm1, %v443_v6, %v444_v8  ;;  %v449_v38 = vrot.slane %v2715_v21, 1  ;;  %v450_v39 = vrot.slane %v2313_v33, 1  ;;  %v2316_v42 = vld [vmem:[%s3121_s1 + $0x1e0] sm:$0xff]   ;;  %v2321_v55 = vld [vmem:[%s3121_s1 + $0x168] sm:$0xff]   ;;  %v2794_v6 = vld [vmem:[%s2637_s4 + $0x54] sm:$0xff]   ;;  %p2351_p1 = pneg %p2350_p0  ;;  %s2444_s5 = smov [#allocation2]  }
  0x28   : > { %1873 = vmatpush3.bf16.msra.mxu0 %v2278_v22  ;;  %v373_v20 = vrot.slane %v371_v15, 1  ;;  %v376_v22 = vshll.u32 %v2307_v19, 16  ;;  %v2318_v46 = vld [vmem:[%s3121_s1 + $0x1a0] sm:$0xff]   ;;  %v393_v49 = vshrl.u32 %v2740_v35, 16  ;;  %v395_v50 = vshll.u32 %v2740_v35, 16  ;;  %v2323_v61 = vld [vmem:[%s3121_s1 + $0x128] sm:$0xff]  }
  0x29   : > { %1937 = vmatpush3.bf16.msra.mxu1 %v2279_v23  ;;  %1874 = vmatprep.subr.bf16.mxu0 %v2280_v24  ;;  %v2704_v16 = vsel %vm331_vm0, %v362_v9, %v366_v12  ;;  %v446_v23 = vrot.slane %v2686_v4, 1  ;;  %v447_v24 = vrot.slane %v2307_v19, 1  ;;  %v2776_v56 = vsel %vm436_vm1, %v449_v38, %v450_v39  ;;  %v2325_v3 = vld [vmem:[%s2637_s4 + $0x50] ss:$0 sps:$4 sm:$0x11]   ;;  %v2336_v33 = vld [vmem:[%s3121_s1 + $0x1b8] sm:$0xff]  }
  0x2a   : > { %1938 = vmatprep.subr.bf16.mxu1 %v2281_v25  ;;  %v2309_v25 = vld [vmem:[%s3121_s1 + $0x158] sm:$0xff]   ;;  %v397_v54 = vrot.slane %v395_v50, 1  ;;  %v405_v5 = vshrl.u32 %v2768_v53, 16  ;;  %v412_v9 = vshll.u32 %v2325_v3, 16  ;;  %v2329_v12 = vld [vmem:[%s3121_s1 + $0x130] sm:$0xff]  }
  0x2b   : > { %v2744_v36 = vsel %vm436_vm1, %v446_v23, %v447_v24  ;;  %v2330_v15 = vld [vmem:[%s3121_s1 + $0x1b0] sm:$0xff]   ;;  %v2331_v19 = vld [vmem:[%s2637_s4 + $0x5c] ss:$0 sps:$4 sm:$0x11]   ;;  %v456_v23 = vrot.slane %v2325_v3, 1  ;;  %v417_v24 = vshrl.u32 %v2794_v6, 16 }
  0x2c   : > { %1875 = vmatpush3.bf16.msra.mxu0 %v2282_v26  ;;  %v374_v26 = vor.u32 %v373_v20, %v369_v11  ;;  %v398_v59 = vor.u32 %v397_v54, %v393_v49  ;;  %v2328_v11 = vld [vmem:[%s3121_s1 + $0x1f0] sm:$0xff]   ;;  %v419_v20 = vshll.u32 %v2794_v6, 16 }
  0x2d   : > { %1939 = vmatpush3.bf16.msra.mxu1 %v2283_v27  ;;  %1876 = vmatprep.subr.bf16.mxu0 %v2284_v28  ;;  %v378_v27 = vrot.slane %v376_v22, 1  ;;  %v2310_v28 = vld [vmem:[%s3121_s1 + $0x1d8] sm:$0xff]   ;;  %v455_v22 = vrot.slane %v2768_v53, 1 }
  0x2e   : > { %1940 = vmatprep.subr.bf16.mxu1 %v2285_v29  ;;  %v2311_v29 = vld [vmem:[%s3121_s1 + $0x118] sm:$0xff]  }
  0x2f   : > { %v2847_v38 = vsel %vm436_vm1, %v455_v22, %v456_v23 }
  0x30   : > { %1877 = vmatpush3.bf16.msra.mxu0 %v2286_v30  ;;  %v381_v30 = vshrl.u32 %v2715_v21, 16 }
  0x31   : > { %1941 = vmatpush3.bf16.msra.mxu1 %v2287_v31  ;;  %1990 = vmatprep.subr.bf16.mxu0 %v2291_v40  ;;  %v2731_v31 = vsel %vm331_vm0, %v374_v26, %v378_v27  ;;  %v2315_v40 = vld [vmem:[%s3121_s1 + $0x160] sm:$0xff]   ;;  %v2333_v26 = vld [vmem:[%s3121_s1 + $0x178] sm:$0xff]   ;;  %v421_v27 = vrot.slane %v419_v20, 1 }
  0x32   : > { %2054 = vmatprep.subr.bf16.mxu1 %v2292_v43  ;;  %v390_v43 = vrot.slane %v388_v37, 1 }
  0x33   : > { %1137 = vmatmul.mubr.bf16.vlgmr.msra.gmra.mrb[0].mxu0 %v2288_v32  ;;  %v2312_v32 = vld [vmem:[%s3121_s1 + $0x198] sm:$0xff]   ;;  %v422_v39 = vor.u32 %v421_v27, %v417_v24 }
  0x34   : > { %1234 = vmatmul.mubr.bf16.vlgmr.msra.gmra.mrb[0].mxu1 %v439_v44  ;;  %1991 = vmatpush3.bf16.msra.mxu0 %v2293_v45  ;;  %v2317_v44 = vld [vmem:[%s3121_s1 + $0x120] sm:$0xff]  }
  0x35   : > { %2055 = vmatpush3.bf16.msra.mxu1 %v2294_v47  ;;  %1241 = vmatprep.mubr.bf16.mxu1 %v2661_v52  ;;  %v2319_v47 = vld [vmem:[%s2637_s4 + $0x44] ss:$0 sps:$4 sm:$0x11]  }
  0x36   : > { %1992 = vmatprep.subr.bf16.mxu0 %v2297_v57  ;;  %2056 = vmatprep.subr.bf16.mxu1 %v2298_v58  ;;  %v400_v51 = vshll.u32 %v2319_v47, 16  ;;  %v452_v57 = vrot.slane %v2740_v35, 1  ;;  %v2322_v58 = vld [vmem:[%s3121_s1 + $0x1e8] sm:$0xff]   ;;  %v453_v1 = vrot.slane %v2319_v47, 1 }
  0x37   : > { %1144 = vmatprep.mubr.bf16.mxu0 %v2682_v2 }
  0x38   : > { %1993 = vmatpush3.bf16.msra.mxu0 %v2299_v63  ;;  %v402_v60 = vrot.slane %v400_v51, 1  ;;  %v2324_v63 = vld [vmem:[%s3121_s1 + $0x1a8] sm:$0xff]  }
  0x39   : > { %2057 = vmatpush3.bf16.msra.mxu1 %v2300_v0  ;;  %1994 = vmatprep.subr.bf16.mxu0 %v2303_v10  ;;  %v407_v0 = vshll.u32 %v2768_v53, 16  ;;  %v2327_v10 = vld [vmem:[%s3121_s1 + $0x170] sm:$0xff]  }
  0x3a   : > { %2058 = vmatprep.subr.bf16.mxu1 %v2304_v13  ;;  %v2797_v7 = vsel %vm331_vm0, %v398_v59, %v402_v60  ;;  %v2811_v13 = vsel %vm436_vm1, %v452_v57, %v453_v1  ;;  %v2346_v57 = vld [vmem:[%s2637_s4 + $0x74] ss:$0 sps:$4 sm:$0x11]  }
  0x3b   : > { %1145 = vmatmul.mubr.bf16.gmra.mrb[4].mxu0 %v2290_v34  ;;  %v383_v34 = vshll.u32 %v2715_v21, 16  ;;  %v409_v8 = vrot.slane %v407_v0, 1  ;;  %v518_v3 = vrot.slane %v2346_v57, 1 }
  0x3c   : > { %1242 = vmatmul.mubr.bf16.gmra.mrb[4].mxu1 %v2672_v62  ;;  %1152 = vmatprep.mubr.bf16.mxu0 %v2704_v16 }
  0x3d   : > { %1249 = vmatprep.mubr.bf16.mxu1 %v2686_v4  ;;  %1995 = vmatpush3.bf16.msra.mxu0 %v2305_v14  ;;  %v385_v41 = vrot.slane %v383_v34, 1  ;;  %v414_v14 = vrot.slane %v412_v9, 1  ;;  %v2337_v34 = vld [vmem:[%s3121_s1 + $0x200] sm:$0xff]  }
  0x3e   : > { %2059 = vmatpush3.bf16.msra.mxu1 %v2306_v18  ;;  %1996 = vmatprep.subr.bf16.mxu0 %v2309_v25  ;;  %v410_v18 = vor.u32 %v409_v8, %v405_v5  ;;  %v2822_v25 = vld [vmem:[%s2637_s4 + $0x60] sm:$0xff]  }
  0x3f   : > { %2060 = vmatprep.subr.bf16.mxu1 %v2310_v28  ;;  %v386_v45 = vor.u32 %v385_v41, %v381_v30  ;;  %v2334_v28 = vld [vmem:[%s3121_s1 + $0x1f8] sm:$0xff]   ;;  %v424_v30 = vshll.u32 %v2331_v19, 16  ;;  %v481_v37 = vshll.u32 %v2822_v25, 16  ;;  %v479_v41 = vshrl.u32 %v2822_v25, 16 }
  0x40   : > { %v491_v47 = vrot.slane %v2822_v25, 1 }
  0x41   : > { %1997 = vmatpush3.bf16.msra.mxu0 %v2311_v29  ;;  %v2763_v48 = vsel %vm331_vm0, %v386_v45, %v390_v43  ;;  %v2832_v29 = vsel %vm331_vm0, %v410_v18, %v414_v14  ;;  %v458_v43 = vrot.slane %v2794_v6, 1  ;;  %v2339_v14 = vld [vmem:[%s3121_s1 + $0x210] sm:$0xff]  }
  0x42   : > { %2061 = vmatpush3.bf16.msra.mxu1 %v2312_v32  ;;  %1998 = vmatprep.subr.bf16.mxu0 %v2315_v40  ;;  %v2335_v32 = vld [vmem:[%s3121_s1 + $0x138] sm:$0xff]   ;;  %v426_v40 = vrot.slane %v424_v30, 1 }
  0x43   : > { %1153 = vmatmul.mubr.bf16.gmra.mrb[8].mxu0 %v2661_v52  ;;  %2062 = vmatprep.subr.bf16.mxu1 %v2316_v42  ;;  %v483_v42 = vrot.slane %v481_v37, 1 }
  0x44   : > { %1250 = vmatmul.mubr.bf16.gmra.mrb[8].mxu1 %v2707_v17  ;;  %1160 = vmatprep.mubr.bf16.mxu0 %v2731_v31  ;;  %v2854_v45 = vsel %vm331_vm0, %v422_v39, %v426_v40 }
  0x45   : > { %1257 = vmatprep.mubr.bf16.mxu1 %v2715_v21  ;;  %1999 = vmatpush3.bf16.msra.mxu0 %v2317_v44  ;;  %v459_v44 = vrot.slane %v2331_v19, 1  ;;  %v484_v49 = vor.u32 %v483_v42, %v479_v41 }
  0x46   : > { %2063 = vmatpush3.bf16.msra.mxu1 %v2318_v46  ;;  %2000 = vmatprep.subr.bf16.mxu0 %v2321_v55  ;;  %v2343_v46 = vld [vmem:[%s2637_s4 + $0x68] ss:$0 sps:$4 sm:$0x11]   ;;  %v2864_v55 = vld [vmem:[%s2637_s4 + $0x6c] sm:$0xff]   ;;  %s2352_s4 = sshll.u32 %s2444_s5, 4  ;;  %s2353_s4 = int_to_ptr.vmem [resolvable:$false] %s2352_s4 }
  0x47   : > { %2064 = vmatprep.subr.bf16.mxu1 %v2322_v58  ;;  %v486_v50 = vshll.u32 %v2343_v46, 16  ;;  %v492_v51 = vrot.slane %v2343_v46, 1  ;;  %v2861_v54 = vsel %vm436_vm1, %v458_v43, %v459_v44  ;;  %v505_v60 = vshrl.u32 %v2864_v55, 16  ;;  %s2354_s7 = scalar_lea.vmem %s2353_s4, 4096  ;;  %p2355_p2 = scmp.lt.s32.totalorder %s3061_s16, %s2353_s4 }
  0x48   : > { %v517_v0 = vrot.slane %v2864_v55, 1  ;;  %p2356_p4 = scmp.lt.s32.totalorder %s2354_s7, %s2348_s6 }
  0x49   : > { %2001 = vmatpush3.bf16.msra.mxu0 %v2323_v61  ;;  %v488_v58 = vrot.slane %v486_v50, 1  ;;  %v2868_v59 = vsel %vm436_vm1, %v491_v47, %v492_v51  ;;  %v507_v61 = vshll.u32 %v2864_v55, 16 }
  0x4a   : > { %2065 = vmatpush3.bf16.msra.mxu1 %v2324_v63  ;;  %2002 = vmatprep.subr.bf16.mxu0 %v2327_v10  ;;  %v512_v63 = vshll.u32 %v2346_v57, 16  ;;  %v2879_v9 = vsel %vm436_vm1, %v517_v0, %v518_v3  ;;  %p2357_p5 = por %p2356_p4, %p2355_p2 }
  0x4b   : > { %1161 = vmatmul.mubr.bf16.gmra.mrb[12].mxu0 %v2686_v4  ;;  %2066 = vmatprep.subr.bf16.mxu1 %v2328_v11  ;;  %v2875_v1 = vsel %vm331_vm0, %v484_v49, %v488_v58  ;;  %v509_v5 = vrot.slane %v507_v61, 1 }
  0x4c   : > { %1258 = vmatmul.mubr.bf16.gmra.mrb[12].mxu1 %v2744_v36  ;;  %1168 = vmatprep.mubr.bf16.mxu0 %v2763_v48  ;;  %v514_v8 = vrot.slane %v512_v63, 1  ;;  %p2358_p6 = pnand %p2357_p5, %p2351_p1 }
  0x4d   : > { %1265 = vmatprep.mubr.bf16.mxu1 %v2740_v35  ;;  %2003 = vmatpush3.bf16.msra.mxu0 %v2329_v12  ;;  %v510_v10 = vor.u32 %v509_v5, %v505_v60  ;;  %v2338_v12 = vld [vmem:[%s3121_s1 + $0x208] sm:$0xff]  }
  0x4e   : > { %2067 = vmatpush3.bf16.msra.mxu1 %v2330_v15  ;;  %2004 = vmatprep.subr.bf16.mxu0 %v2333_v26 }
  0x4f   : > { %2068 = vmatprep.subr.bf16.mxu1 %v2334_v28  ;;  %v515_v11 = vsel %vm331_vm0, %v510_v10, %v514_v8 }
  0x51   : > { %2005 = vmatpush3.bf16.msra.mxu0 %v2335_v32 }
  0x52   : > { %2069 = vmatpush3.bf16.msra.mxu1 %v2336_v33  ;;  %2134 = vmatprep.subr.bf16.mxu0 %v2337_v34 }
  0x53   : > { %1169 = vmatmul.mubr.bf16.gmra.mrb[16].mxu0 %v2715_v21  ;;  %2166 = vmatprep.subr.bf16.mxu1 %v2337_v34 }
  0x54   : > { %1266 = vmatmul.mubr.bf16.gmra.mrb[16].mxu1 %v2776_v56  ;;  %1176 = vmatprep.mubr.bf16.mxu0 %v2797_v7 }
  0x55   : > { %1273 = vmatprep.mubr.bf16.mxu1 %v2768_v53 }
  0x5b   : > { %1177 = vmatmul.mubr.bf16.gmra.mrb[20].mxu0 %v2740_v35 }
  0x5c   : > { %1274 = vmatmul.mubr.bf16.gmra.mrb[20].mxu1 %v2811_v13  ;;  %1184 = vmatprep.mubr.bf16.mxu0 %v2832_v29 }
  0x5d   : > { %1281 = vmatprep.mubr.bf16.mxu1 %v2794_v6 }
  0x63   : > { %1185 = vmatmul.mubr.bf16.gmra.mrb[24].mxu0 %v2768_v53 }
  0x64   : > { %1282 = vmatmul.mubr.bf16.gmra.mrb[24].mxu1 %v2847_v38  ;;  %1192 = vmatprep.mubr.bf16.mxu0 %v2854_v45 }
  0x65   : > { %1289 = vmatprep.mubr.bf16.mxu1 %v2822_v25 }
  0x6b   : > { %1193 = vmatmul.mubr.bf16.gmra.mrb[28].mxu0 %v2794_v6 }
  0x6c   : > { %1290 = vmatmul.mubr.bf16.gmra.mrb[28].mxu1 %v2861_v54  ;;  %1330 = vmatprep.mubr.bf16.mxu0 %v2672_v62  ;;  %v2341_v62 = vld [vmem:[%s3121_s1 + $0x220] sm:$0xff]  }
  0x6d   : > { %1427 = vmatprep.mubr.bf16.mxu1 %v2704_v16 }
  0x73   : > { %1331 = vmatmul.mubr.bf16.vlgmr.msra.gmra.mrb[32].mxu0 %v2682_v2  ;;  %v2342_v2 = vld [vmem:[%s3121_s1 + $0x228] sm:$0xff]  }
  0x74   : > { %1428 = vmatmul.mubr.bf16.vlgmr.msra.gmra.mrb[32].mxu1 %v2661_v52  ;;  %2135 = vmatpush3.bf16.msra.mxu0 %v2337_v34  ;;  %v2340_v52 = vld [vmem:[%s3121_s1 + $0x218] sm:$0xff]  }
  0x75   : > { %2174 = vmatpush3.bf16.msra.mxu1 %v2337_v34  ;;  %1435 = vmatprep.mubr.bf16.mxu1 %v2731_v31 }
  0x76   : > { %2167 = vmatprep.subr.bf16.mxu1 %v2338_v12  ;;  %1338 = vmatprep.mubr.bf16.mxu0 %v2707_v17 }
  0x77   : > { %2136 = vmatprep.subr.bf16.mxu0 %v2338_v12 }
  0x78   : > { %2137 = vmatpush3.bf16.msra.mxu0 %v2338_v12 }
  0x79   : > { %2175 = vmatpush3.bf16.msra.mxu1 %v2338_v12  ;;  %2138 = vmatprep.subr.bf16.mxu0 %v2339_v14 }
  0x7a   : > { %2168 = vmatprep.subr.bf16.mxu1 %v2339_v14 }
  0x7b   : > { %1339 = vmatmul.mubr.bf16.gmra.mrb[36].mxu0 %v2704_v16  ;;  %v2347_v16 = vld [vmem:[%s3121_s1 + $0x238] sm:$0xff]  }
  0x7c   : > { %1436 = vmatmul.mubr.bf16.gmra.mrb[36].mxu1 %v2686_v4  ;;  %1346 = vmatprep.mubr.bf16.mxu0 %v2744_v36  ;;  %v2344_v4 = vld [vmem:[%s3121_s1 + $0x230] sm:$0xff]  }
  0x7d   : > { %1443 = vmatprep.mubr.bf16.mxu1 %v2763_v48  ;;  %2176 = vmatpush3.bf16.msra.mxu1 %v2339_v14 }
  0x7e   : > { %2169 = vmatprep.subr.bf16.mxu1 %v2340_v52  ;;  %2139 = vmatpush3.bf16.msra.mxu0 %v2339_v14 }
  0x7f   : > { %2140 = vmatprep.subr.bf16.mxu0 %v2340_v52 }
  0x81   : > { %2177 = vmatpush3.bf16.msra.mxu1 %v2340_v52 }
  0x82   : > { %2170 = vmatprep.subr.bf16.mxu1 %v2341_v62  ;;  %2141 = vmatpush3.bf16.msra.mxu0 %v2340_v52 }
  0x83   : > { %2142 = vmatprep.subr.bf16.mxu0 %v2341_v62  ;;  %1347 = vmatmul.mubr.bf16.gmra.mrb[40].mxu0 %v2731_v31 }
  0x84   : > { %1444 = vmatmul.mubr.bf16.gmra.mrb[40].mxu1 %v2715_v21  ;;  %1354 = vmatprep.mubr.bf16.mxu0 %v2776_v56 }
  0x85   : > { %1451 = vmatprep.mubr.bf16.mxu1 %v2797_v7  ;;  %2178 = vmatpush3.bf16.msra.mxu1 %v2341_v62 }
  0x86   : > { %2171 = vmatprep.subr.bf16.mxu1 %v2342_v2  ;;  %2143 = vmatpush3.bf16.msra.mxu0 %v2341_v62 }
  0x87   : > { %2144 = vmatprep.subr.bf16.mxu0 %v2342_v2 }
  0x89   : > { %2179 = vmatpush3.bf16.msra.mxu1 %v2342_v2 }
  0x8a   : > { %2172 = vmatprep.subr.bf16.mxu1 %v2344_v4  ;;  %2145 = vmatpush3.bf16.msra.mxu0 %v2342_v2 }
  0x8b   : > { %2146 = vmatprep.subr.bf16.mxu0 %v2344_v4  ;;  %1355 = vmatmul.mubr.bf16.gmra.mrb[44].mxu0 %v2763_v48 }
  0x8c   : > { %1452 = vmatmul.mubr.bf16.gmra.mrb[44].mxu1 %v2740_v35  ;;  %1362 = vmatprep.mubr.bf16.mxu0 %v2811_v13 }
  0x8d   : > { %1459 = vmatprep.mubr.bf16.mxu1 %v2832_v29  ;;  %2180 = vmatpush3.bf16.msra.mxu1 %v2344_v4 }
  0x8e   : > { %2173 = vmatprep.subr.bf16.mxu1 %v2347_v16  ;;  %2147 = vmatpush3.bf16.msra.mxu0 %v2344_v4 }
  0x8f   : > { %2148 = vmatprep.subr.bf16.mxu0 %v2347_v16 }
  0x91   : > { %2181 = vmatpush3.bf16.msra.mxu1 %v2347_v16 }
  0x92   : > { %2149 = vmatpush3.bf16.msra.mxu0 %v2347_v16 }
  0x93   : > { %1363 = vmatmul.mubr.bf16.gmra.mrb[48].mxu0 %v2797_v7 }
  0x94   : > { %1460 = vmatmul.mubr.bf16.gmra.mrb[48].mxu1 %v2768_v53  ;;  %1370 = vmatprep.mubr.bf16.mxu0 %v2847_v38 }
  0x95   : > { %1467 = vmatprep.mubr.bf16.mxu1 %v2854_v45 }
  0x9b   : > { %1371 = vmatmul.mubr.bf16.gmra.mrb[52].mxu0 %v2832_v29 }
  0x9c   : > { %1468 = vmatmul.mubr.bf16.gmra.mrb[52].mxu1 %v2794_v6  ;;  %1378 = vmatprep.mubr.bf16.mxu0 %v2861_v54 }
  0x9d   : > { %1475 = vmatprep.mubr.bf16.mxu1 %v2875_v1 }
  0xa3   : > { %1379 = vmatmul.mubr.bf16.gmra.mrb[56].mxu0 %v2854_v45 }
  0xa4   : > { %1476 = vmatmul.mubr.bf16.gmra.mrb[56].mxu1 %v2822_v25  ;;  %1386 = vmatprep.mubr.bf16.mxu0 %v2868_v59 }
  0xa5   : > { %1483 = vmatprep.mubr.bf16.mxu1 %v515_v11 }
  0xab   : > { %1387 = vmatmul.mubr.bf16.gmra.mrb[60].mxu0 %v2875_v1 }
  0xac   : > { %1484 = vmatmul.mubr.bf16.gmra.mrb[60].mxu1 %v2864_v55  ;;  %2150 = vmatprep.mubr.bf16.mxu0 %v2707_v17  ;;  %v2945_v17 = vld [vmem:[%s3122_s2] ss:$0 sm:$0xff] }
  0xad   : > { %2158 = vmatprep.mubr.bf16.mxu1 %v2847_v38 }
  0xb3   : > { %2151 = vmatmul.mubr.bf16.vlgmr.msra.gmra.mrb[64].mxu0 %v2744_v36 }
  0xb4   : > { %2159 = vmatmul.mubr.bf16.vlgmr.msra.gmra.mrb[64].mxu1 %v2861_v54  ;;  %2154 = vmatprep.mubr.bf16.mxu0 %v2776_v56 }
  0xb5   : > { %2162 = vmatprep.mubr.bf16.mxu1 %v2868_v59 }
  0xbb   : > { %2155 = vmatmul.mubr.bf16.gmra.mrb[68].mxu0 %v2811_v13 }
  0xbc   : > { %2163 = vmatmul.mubr.bf16.gmra.mrb[68].mxu1 %v2879_v9 }
 0x106   : > { %v1878_v6 = vpop.f32.mrb[0].mxu0 }
 0x107   : > { %v1942_v21 = vpop.f32.mrb[0].mxu1  ;;  %v1879_v15 = vpop.f32.mrb[1].mxu0 }
 0x108   : > { %v1943_v31 = vpop.f32.mrb[1].mxu1  ;;  %v1880_v36 = vadd.f32 %v1879_v15, %v1878_v6  ;;  %v1881_v18 = vpop.f32.mrb[2].mxu0 }
 0x109   : > { %v1944_v35 = vadd.f32 %v1943_v31, %v1942_v21  ;;  %v1945_v48 = vpop.f32.mrb[2].mxu1  ;;  %v1882_v56 = vpop.f32.mrb[3].mxu0 }
 0x10a   : > { %v1946_v53 = vpop.f32.mrb[3].mxu1  ;;  %v1139_v19 = vadd.f32 %v1880_v36, %v2945_v17  ;;  %v1883_v20 = vadd.f32 %v1882_v56, %v1881_v18 }
 0x10b   : > { %v1947_v7 = vadd.f32 %v1946_v53, %v1945_v48 }
 0x10c   : > { %v2948_v23 = vadd.f32 %v1944_v35, %v1139_v19  ;;  %v1142_v24 = vadd.f32 %v1883_v20, %v2945_v17 }
 0x10e   : > { %v2951_v28 = vadd.f32 %v1947_v7, %v1142_v24  ;;  %v1884_v29 = vpop.f32.mrb[4].mxu0 }
 0x10f   : > { %v1948_v13 = vpop.f32.mrb[4].mxu1  ;;  %v1885_v32 = vpop.f32.mrb[5].mxu0 }
 0x110   : > { %v1949_v22 = vpop.f32.mrb[5].mxu1  ;;  %v1886_v33 = vadd.f32 %v1885_v32, %v1884_v29  ;;  %v1887_v34 = vpop.f32.mrb[6].mxu0 }
 0x111   : > { %v1950_v25 = vadd.f32 %v1949_v22, %v1948_v13  ;;  %v1951_v26 = vpop.f32.mrb[6].mxu1  ;;  %v1888_v37 = vpop.f32.mrb[7].mxu0 }
 0x112   : > { %v1952_v27 = vpop.f32.mrb[7].mxu1  ;;  %v1147_v38 = vadd.f32 %v1886_v33, %v2945_v17  ;;  %v1889_v39 = vadd.f32 %v1888_v37, %v1887_v34 }
 0x113   : > { %v1953_v30 = vadd.f32 %v1952_v27, %v1951_v26 }
 0x114   : > { %v2954_v42 = vadd.f32 %v1950_v25, %v1147_v38  ;;  %v1150_v43 = vadd.f32 %v1889_v39, %v2945_v17 }
 0x116   : > { %v2957_v47 = vadd.f32 %v1953_v30, %v1150_v43  ;;  %v1890_v49 = vpop.f32.mrb[8].mxu0 }
 0x117   : > { %v1954_v40 = vpop.f32.mrb[8].mxu1  ;;  %v1891_v51 = vpop.f32.mrb[9].mxu0 }
 0x118   : > { %v1955_v41 = vpop.f32.mrb[9].mxu1  ;;  %v1892_v54 = vadd.f32 %v1891_v51, %v1890_v49  ;;  %v1893_v55 = vpop.f32.mrb[10].mxu0 }
 0x119   : > { %v1956_v44 = vadd.f32 %v1955_v41, %v1954_v40  ;;  %v1957_v45 = vpop.f32.mrb[10].mxu1  ;;  %v1894_v57 = vpop.f32.mrb[11].mxu0 }
 0x11a   : > { %v1958_v46 = vpop.f32.mrb[11].mxu1  ;;  %v1155_v58 = vadd.f32 %v1892_v54, %v2945_v17  ;;  %v1895_v59 = vadd.f32 %v1894_v57, %v1893_v55 }
 0x11b   : > { %v1959_v50 = vadd.f32 %v1958_v46, %v1957_v45 }
 0x11c   : > { %v2960_v63 = vadd.f32 %v1956_v44, %v1155_v58  ;;  %v1158_v0 = vadd.f32 %v1895_v59, %v2945_v17 }
 0x11e   : > { %v2963_v8 = vadd.f32 %v1959_v50, %v1158_v0  ;;  %v1896_v9 = vpop.f32.mrb[12].mxu0 }
 0x11f   : > { %v1960_v60 = vpop.f32.mrb[12].mxu1  ;;  %v1897_v11 = vpop.f32.mrb[13].mxu0 }
 0x120   : > { %v1961_v61 = vpop.f32.mrb[13].mxu1  ;;  %v1898_v12 = vadd.f32 %v1897_v11, %v1896_v9  ;;  %v1899_v14 = vpop.f32.mrb[14].mxu0 }
 0x121   : > { %v1962_v1 = vadd.f32 %v1961_v61, %v1960_v60  ;;  %v1963_v3 = vpop.f32.mrb[14].mxu1  ;;  %v1900_v52 = vpop.f32.mrb[15].mxu0 }
 0x122   : > { %v1964_v5 = vpop.f32.mrb[15].mxu1  ;;  %v1163_v62 = vadd.f32 %v1898_v12, %v2945_v17  ;;  %v1901_v2 = vadd.f32 %v1900_v52, %v1899_v14 }
 0x123   : > { %v1965_v10 = vadd.f32 %v1964_v5, %v1963_v3 }
 0x124   : > { %v2966_v21 = vadd.f32 %v1962_v1, %v1163_v62  ;;  %v1166_v31 = vadd.f32 %v1901_v2, %v2945_v17 }
 0x126   : > { %v2969_v6 = vadd.f32 %v1965_v10, %v1166_v31  ;;  %v1902_v7 = vpop.f32.mrb[16].mxu0 }
 0x127   : > { %v1966_v4 = vpop.f32.mrb[16].mxu1  ;;  %v1903_v36 = vpop.f32.mrb[17].mxu0 }
 0x128   : > { %v1967_v16 = vpop.f32.mrb[17].mxu1  ;;  %v1904_v18 = vadd.f32 %v1903_v36, %v1902_v7  ;;  %v1905_v56 = vpop.f32.mrb[18].mxu0 }
 0x129   : > { %v1968_v35 = vadd.f32 %v1967_v16, %v1966_v4  ;;  %v1969_v48 = vpop.f32.mrb[18].mxu1  ;;  %v1906_v19 = vpop.f32.mrb[19].mxu0 }
 0x12a   : > { %v1970_v53 = vpop.f32.mrb[19].mxu1  ;;  %v1171_v20 = vadd.f32 %v1904_v18, %v2945_v17  ;;  %v1907_v13 = vadd.f32 %v1906_v19, %v1905_v56 }
 0x12b   : > { %v1971_v15 = vadd.f32 %v1970_v53, %v1969_v48 }
 0x12c   : > { %v2972_v25 = vadd.f32 %v1968_v35, %v1171_v20  ;;  %v1174_v26 = vadd.f32 %v1907_v13, %v2945_v17 }
 0x12e   : > { %v2975_v32 = vadd.f32 %v1971_v15, %v1174_v26  ;;  %v1908_v33 = vpop.f32.mrb[20].mxu0 }
 0x12f   : > { %v1972_v22 = vpop.f32.mrb[20].mxu1  ;;  %v1909_v37 = vpop.f32.mrb[21].mxu0 }
 0x130   : > { %v1973_v24 = vpop.f32.mrb[21].mxu1  ;;  %v1910_v38 = vadd.f32 %v1909_v37, %v1908_v33  ;;  %v1911_v39 = vpop.f32.mrb[22].mxu0 }
 0x131   : > { %v1974_v27 = vadd.f32 %v1973_v24, %v1972_v22  ;;  %v1975_v29 = vpop.f32.mrb[22].mxu1  ;;  %v1912_v40 = vpop.f32.mrb[23].mxu0 }
 0x132   : > { %v1976_v30 = vpop.f32.mrb[23].mxu1  ;;  %v1179_v41 = vadd.f32 %v1910_v38, %v2945_v17  ;;  %v1913_v43 = vadd.f32 %v1912_v40, %v1911_v39 }
 0x133   : > { %v1977_v34 = vadd.f32 %v1976_v30, %v1975_v29 }
 0x134   : > { %v2978_v46 = vadd.f32 %v1974_v27, %v1179_v41  ;;  %v1182_v49 = vadd.f32 %v1913_v43, %v2945_v17 }
 0x136   : > { %v2981_v55 = vadd.f32 %v1977_v34, %v1182_v49  ;;  %v1914_v57 = vpop.f32.mrb[24].mxu0 }
 0x137   : > { %v1978_v44 = vpop.f32.mrb[24].mxu1  ;;  %v1915_v59 = vpop.f32.mrb[25].mxu0 }
 0x138   : > { %v1979_v45 = vpop.f32.mrb[25].mxu1  ;;  %v1916_v60 = vadd.f32 %v1915_v59, %v1914_v57  ;;  %v1917_v61 = vpop.f32.mrb[26].mxu0 }
 0x139   : > { %v1980_v50 = vadd.f32 %v1979_v45, %v1978_v44  ;;  %v1981_v51 = vpop.f32.mrb[26].mxu1  ;;  %v1918_v0 = vpop.f32.mrb[27].mxu0 }
 0x13a   : > { %v1982_v54 = vpop.f32.mrb[27].mxu1  ;;  %v1187_v1 = vadd.f32 %v1916_v60, %v2945_v17  ;;  %v1919_v3 = vadd.f32 %v1918_v0, %v1917_v61 }
 0x13b   : > { %v1983_v58 = vadd.f32 %v1982_v54, %v1981_v51 }
 0x13c   : > { %v2984_v10 = vadd.f32 %v1980_v50, %v1187_v1  ;;  %v1190_v11 = vadd.f32 %v1919_v3, %v2945_v17 }
 0x13e   : > { %v2987_v62 = vadd.f32 %v1983_v58, %v1190_v11  ;;  %v1920_v2 = vpop.f32.mrb[28].mxu0 }
 0x13f   : > { %v1984_v5 = vpop.f32.mrb[28].mxu1  ;;  %v1921_v16 = vpop.f32.mrb[29].mxu0 }
 0x140   : > { %v1985_v9 = vpop.f32.mrb[29].mxu1  ;;  %v1922_v31 = vadd.f32 %v1921_v16, %v1920_v2  ;;  %v1923_v35 = vpop.f32.mrb[30].mxu0 }
 0x141   : > { %v1986_v12 = vadd.f32 %v1985_v9, %v1984_v5  ;;  %v1987_v14 = vpop.f32.mrb[30].mxu1  ;;  %v1924_v48 = vpop.f32.mrb[31].mxu0 }
 0x142   : > { %v1988_v52 = vpop.f32.mrb[31].mxu1  ;;  %v1195_v53 = vadd.f32 %v1922_v31, %v2945_v17  ;;  %v1925_v7 = vadd.f32 %v1924_v48, %v1923_v35 }
 0x143   : > { %v1989_v4 = vadd.f32 %v1988_v52, %v1987_v14 }
 0x144   : > { %v2990_v18 = vadd.f32 %v1986_v12, %v1195_v53  ;;  %v1198_v56 = vadd.f32 %v1925_v7, %v2945_v17 }
 0x146   : > { %v2993_v22 = vadd.f32 %v1989_v4, %v1198_v56  ;;  %v2006_v24 = vpop.f32.mrb[32].mxu0 }
 0x147   : > { %v2070_v15 = vpop.f32.mrb[32].mxu1  ;;  %v2007_v27 = vpop.f32.mrb[33].mxu0 }
 0x148   : > { %v2071_v36 = vpop.f32.mrb[33].mxu1  ;;  %v2008_v29 = vadd.f32 %v2007_v27, %v2006_v24  ;;  %v2009_v30 = vpop.f32.mrb[34].mxu0 }
 0x149   : > { %v2072_v19 = vadd.f32 %v2071_v36, %v2070_v15  ;;  %v2073_v20 = vpop.f32.mrb[34].mxu1  ;;  %v2010_v33 = vpop.f32.mrb[35].mxu0 }
 0x14a   : > { %v2074_v13 = vpop.f32.mrb[35].mxu1  ;;  %v1333_v34 = vadd.f32 %v2008_v29, %v2948_v23  ;;  %v2011_v37 = vadd.f32 %v2010_v33, %v2009_v30 }
 0x14b   : > { %v2075_v26 = vadd.f32 %v2074_v13, %v2073_v20 }
 0x14c   : > { %v1336_v40 = vadd.f32 %v2011_v37, %v2951_v28  ;;  %v2997_v43 = vadd.f32 %v2072_v19, %v1333_v34 }
 0x14e   : > { %v2012_v45 = vpop.f32.mrb[36].mxu0  ;;  %v2999_v50 = vadd.f32 %v2075_v26, %v1336_v40 }
 0x14f   : > { %v2076_v38 = vpop.f32.mrb[36].mxu1  ;;  %v2013_v51 = vpop.f32.mrb[37].mxu0 }
 0x150   : > { %v2077_v39 = vpop.f32.mrb[37].mxu1  ;;  %v2014_v54 = vadd.f32 %v2013_v51, %v2012_v45  ;;  %v2015_v57 = vpop.f32.mrb[38].mxu0 }
 0x151   : > { %v2078_v41 = vadd.f32 %v2077_v39, %v2076_v38  ;;  %v2079_v17 = vpop.f32.mrb[38].mxu1  ;;  %v2016_v58 = vpop.f32.mrb[39].mxu0 }
 0x152   : > { %v2080_v44 = vpop.f32.mrb[39].mxu1  ;;  %v1341_v23 = vadd.f32 %v2014_v54, %v2954_v42  ;;  %v2017_v59 = vadd.f32 %v2016_v58, %v2015_v57 }
 0x153   : > { %v2081_v49 = vadd.f32 %v2080_v44, %v2079_v17 }
 0x154   : > { %v1344_v28 = vadd.f32 %v2017_v59, %v2957_v47  ;;  %v3003_v3 = vadd.f32 %v2078_v41, %v1341_v23 }
 0x156   : > { %v2018_v9 = vpop.f32.mrb[40].mxu0  ;;  %v3005_v12 = vadd.f32 %v2081_v49, %v1344_v28 }
 0x157   : > { %v2082_v60 = vpop.f32.mrb[40].mxu1  ;;  %v2019_v14 = vpop.f32.mrb[41].mxu0 }
 0x158   : > { %v2083_v61 = vpop.f32.mrb[41].mxu1  ;;  %v2020_v52 = vadd.f32 %v2019_v14, %v2018_v9  ;;  %v2021_v2 = vpop.f32.mrb[42].mxu0 }
 0x159   : > { %v2084_v0 = vadd.f32 %v2083_v61, %v2082_v60  ;;  %v2085_v1 = vpop.f32.mrb[42].mxu1  ;;  %v2022_v4 = vpop.f32.mrb[43].mxu0 }
 0x15a   : > { %v2086_v5 = vpop.f32.mrb[43].mxu1  ;;  %v1349_v42 = vadd.f32 %v2020_v52, %v2960_v63  ;;  %v2023_v16 = vadd.f32 %v2022_v4, %v2021_v2 }
 0x15b   : > { %v2087_v11 = vadd.f32 %v2086_v5, %v2085_v1 }
 0x15c   : > { %v1352_v47 = vadd.f32 %v2023_v16, %v2963_v8  ;;  %v3009_v7 = vadd.f32 %v2084_v0, %v1349_v42 }
 0x15e   : > { %v2024_v36 = vpop.f32.mrb[44].mxu0  ;;  %v3011_v19 = vadd.f32 %v2087_v11, %v1352_v47 }
 0x15f   : > { %v2088_v31 = vpop.f32.mrb[44].mxu1  ;;  %v2025_v20 = vpop.f32.mrb[45].mxu0 }
 0x160   : > { %v2089_v35 = vpop.f32.mrb[45].mxu1  ;;  %v2026_v13 = vadd.f32 %v2025_v20, %v2024_v36  ;;  %v2027_v24 = vpop.f32.mrb[46].mxu0 }
 0x161   : > { %v2090_v48 = vadd.f32 %v2089_v35, %v2088_v31  ;;  %v2091_v53 = vpop.f32.mrb[46].mxu1  ;;  %v2028_v26 = vpop.f32.mrb[47].mxu0 }
 0x162   : > { %v2092_v15 = vpop.f32.mrb[47].mxu1  ;;  %v1357_v63 = vadd.f32 %v2026_v13, %v2966_v21  ;;  %v2029_v27 = vadd.f32 %v2028_v26, %v2027_v24 }
 0x163   : > { %v2093_v56 = vadd.f32 %v2092_v15, %v2091_v53 }
 0x164   : > { %v1360_v8 = vadd.f32 %v2029_v27, %v2969_v6  ;;  %v3015_v37 = vadd.f32 %v2090_v48, %v1357_v63 }
 0x166   : > { %v2030_v39 = vpop.f32.mrb[48].mxu0  ;;  %v3017_v41 = vadd.f32 %v2093_v56, %v1360_v8 }
 0x167   : > { %v2094_v29 = vpop.f32.mrb[48].mxu1  ;;  %v2031_v17 = vpop.f32.mrb[49].mxu0 }
 0x168   : > { %v2095_v30 = vpop.f32.mrb[49].mxu1  ;;  %v2032_v44 = vadd.f32 %v2031_v17, %v2030_v39  ;;  %v2033_v45 = vpop.f32.mrb[50].mxu0 }
 0x169   : > { %v2096_v33 = vadd.f32 %v2095_v30, %v2094_v29  ;;  %v2097_v34 = vpop.f32.mrb[50].mxu1  ;;  %v2034_v49 = vpop.f32.mrb[51].mxu0 }
 0x16a   : > { %v2098_v38 = vpop.f32.mrb[51].mxu1  ;;  %v1365_v21 = vadd.f32 %v2032_v44, %v2972_v25  ;;  %v2035_v51 = vadd.f32 %v2034_v49, %v2033_v45 }
 0x16b   : > { %v2099_v40 = vadd.f32 %v2098_v38, %v2097_v34 }
 0x16c   : > { %v1368_v6 = vadd.f32 %v2035_v51, %v2975_v32  ;;  %v1462_v59 = vadd.f32 %v2096_v33, %v1365_v21 }
 0x16e   : > { %v2036_v61 = vpop.f32.mrb[52].mxu0  ;;  %v1465_v0 = vadd.f32 %v2099_v40, %v1368_v6 }
 0x16f   : > { %v2100_v54 = vpop.f32.mrb[52].mxu1  ;;  %v2037_v1 = vpop.f32.mrb[53].mxu0 }
 0x170   : > { %v2101_v57 = vpop.f32.mrb[53].mxu1  ;;  %v2038_v5 = vadd.f32 %v2037_v1, %v2036_v61  ;;  %v2039_v9 = vpop.f32.mrb[54].mxu0 }
 0x171   : > { %v2102_v58 = vadd.f32 %v2101_v57, %v2100_v54  ;;  %v2103_v23 = vpop.f32.mrb[54].mxu1  ;;  %v2040_v11 = vpop.f32.mrb[55].mxu0 }
 0x172   : > { %v2104_v60 = vpop.f32.mrb[55].mxu1  ;;  %v1373_v14 = vadd.f32 %v2038_v5, %v2978_v46  ;;  %v2041_v52 = vadd.f32 %v2040_v11, %v2039_v9 }
 0x173   : > { %v2105_v28 = vadd.f32 %v2104_v60, %v2103_v23 }
 0x174   : > { %v1376_v4 = vadd.f32 %v2041_v52, %v2981_v55  ;;  %v1470_v16 = vadd.f32 %v2102_v58, %v1373_v14 }
 0x176   : > { %v2042_v35 = vpop.f32.mrb[56].mxu0  ;;  %v1473_v48 = vadd.f32 %v2105_v28, %v1376_v4 }
 0x177   : > { %v2106_v25 = vpop.f32.mrb[56].mxu1  ;;  %v2043_v53 = vpop.f32.mrb[57].mxu0 }
 0x178   : > { %v2107_v2 = vpop.f32.mrb[57].mxu1  ;;  %v2044_v15 = vadd.f32 %v2043_v53, %v2042_v35  ;;  %v2045_v36 = vpop.f32.mrb[58].mxu0 }
 0x179   : > { %v2108_v42 = vadd.f32 %v2107_v2, %v2106_v25  ;;  %v2109_v32 = vpop.f32.mrb[58].mxu1  ;;  %v2046_v56 = vpop.f32.mrb[59].mxu0 }
 0x17a   : > { %v2110_v31 = vpop.f32.mrb[59].mxu1  ;;  %v1381_v20 = vadd.f32 %v2044_v15, %v2984_v10  ;;  %v2047_v46 = vadd.f32 %v2046_v56, %v2045_v36 }
 0x17b   : > { %v2111_v47 = vadd.f32 %v2110_v31, %v2109_v32 }
 0x17c   : > { %v1384_v55 = vadd.f32 %v2047_v46, %v2987_v62  ;;  %v1478_v27 = vadd.f32 %v2108_v42, %v1381_v20 }
 0x17e   : > { %v2048_v30 = vpop.f32.mrb[60].mxu0  ;;  %v1481_v33 = vadd.f32 %v2111_v47, %v1384_v55 }
 0x17f   : > { %v2112_v13 = vpop.f32.mrb[60].mxu1  ;;  %v2049_v34 = vpop.f32.mrb[61].mxu0 }
 0x180   : > { %v2113_v24 = vpop.f32.mrb[61].mxu1  ;;  %v2050_v38 = vadd.f32 %v2049_v34, %v2048_v30  ;;  %v2051_v39 = vpop.f32.mrb[62].mxu0 }
 0x181   : > { %v2114_v26 = vadd.f32 %v2113_v24, %v2112_v13  ;;  %v2115_v63 = vpop.f32.mrb[62].mxu1  ;;  %v2052_v40 = vpop.f32.mrb[63].mxu0 }
 0x182   : > { %v2116_v29 = vpop.f32.mrb[63].mxu1  ;;  %v1389_v10 = vadd.f32 %v2050_v38, %v2990_v18  ;;  %v2053_v17 = vadd.f32 %v2052_v40, %v2051_v39 }
 0x183   : > { %v2117_v8 = vadd.f32 %v2116_v29, %v2115_v63 }
 0x184   : > { %v1392_v49 = vadd.f32 %v2053_v17, %v2993_v22  ;;  %v1486_v54 = vadd.f32 %v2114_v26, %v1389_v10 }
 0x186   : > { %v2152_v23 = vpop.f32.mrb[64].mxu0  ;;  %v1489_v28 = vadd.f32 %v2117_v8, %v1392_v49 }
 0x187   : > { %v2160_v44 = vpop.f32.mrb[64].mxu1  ;;  %v1535_v1 = vadd.f32 %v2152_v23, %v3003_v3  ;;  %v1526_v18 = vpop.f32.mrb[65].mxu0 }
 0x188   : > { %v1567_v45 = vadd.f32 %v2160_v44, %v1470_v16  ;;  %v1558_v62 = vpop.f32.mrb[65].mxu1  ;;  %v2153_v5 = vpop.f32.mrb[66].mxu0 }
 0x189   : > { %v1559_v21 = vadd.f32 %v1558_v62, %v1462_v59  ;;  %v2161_v51 = vpop.f32.mrb[66].mxu1  ;;  %v1527_v59 = vadd.f32 %v1526_v18, %v2997_v43  ;;  %v1591_v9 = vmax.f32 %v1535_v1, 0.0  ;;  %v1538_v3 = vadd.f32 %v2153_v5, %v3005_v12  ;;  %v1529_v11 = vpop.f32.mrb[67].mxu0 }
 0x18a   : > { %v1599_v57 = vmax.f32 %v1567_v45, 0.0  ;;  %v1570_v6 = vadd.f32 %v2161_v51, %v1473_v48  ;;  %v1561_v58 = vpop.f32.mrb[67].mxu1  ;;  %v1530_v52 = vadd.f32 %v1529_v11, %v2999_v50 }
 0x18b   : > { %v1597_v60 = vmax.f32 %v1559_v21, 0.0  ;;  %v1562_v61 = vadd.f32 %v1561_v58, %v1465_v0  ;;  %v1589_v14 = vmax.f32 %v1527_v59, 0.0  ;;  %1607 = vst [vmem:[%s3031_s9 + $0x10] sm:$0xff] %v1591_v9  ;;  %v1592_v43 = vmax.f32 %v1538_v3, 0.0 }
 0x18c   : > { %1615 = vst [vmem:[%s3031_s9 + $0x50] sm:$0xff] %v1599_v57  ;;  %v1600_v22 = vmax.f32 %v1570_v6, 0.0  ;;  %v1590_v42 = vmax.f32 %v1530_v52, 0.0 }
 0x18d   : > { %1613 = vst [vmem:[%s3031_s9 + $0x40] sm:$0xff] %v1597_v60  ;;  %v1598_v0 = vmax.f32 %v1562_v61, 0.0  ;;  %1605 = vst [vmem:[%s3031_s9] sm:$0xff] %v1589_v14 }
 0x18e   : > { %1616 = vst [vmem:[%s3031_s9 + $0x58] sm:$0xff] %v1600_v22  ;;  %1608 = vst [vmem:[%s3031_s9 + $0x18] sm:$0xff] %v1592_v43  ;;  %v2156_v35 = vpop.f32.mrb[68].mxu0 }
 0x18f   : > { %1614 = vst [vmem:[%s3031_s9 + $0x48] sm:$0xff] %v1598_v0  ;;  %v2164_v25 = vpop.f32.mrb[68].mxu1  ;;  %1606 = vst [vmem:[%s3031_s9 + $0x8] sm:$0xff] %v1590_v42  ;;  %v1551_v53 = vadd.f32 %v2156_v35, %v3015_v37  ;;  %v1542_v15 = vpop.f32.mrb[69].mxu0 }
 0x190   : > { %v1583_v2 = vadd.f32 %v2164_v25, %v1486_v54  ;;  %v1574_v4 = vpop.f32.mrb[69].mxu1  ;;  %v1543_v56 = vadd.f32 %v1542_v15, %v3009_v7  ;;  %v2157_v20 = vpop.f32.mrb[70].mxu0 }
 0x191   : > { %v1575_v32 = vadd.f32 %v1574_v4, %v1478_v27  ;;  %v2165_v12 = vpop.f32.mrb[70].mxu1  ;;  %v1595_v13 = vmax.f32 %v1551_v53, 0.0  ;;  %v1554_v24 = vadd.f32 %v2157_v20, %v3017_v41  ;;  %v1545_v37 = vpop.f32.mrb[71].mxu0 }
 0x192   : > { %v1603_v16 = vmax.f32 %v1583_v2, 0.0  ;;  %v1586_v31 = vadd.f32 %v2165_v12, %v1489_v28  ;;  %v1577_v50 = vpop.f32.mrb[71].mxu1  ;;  %v1593_v55 = vmax.f32 %v1543_v56, 0.0  ;;  %v1546_v26 = vadd.f32 %v1545_v37, %v3011_v19 }
 0x193   : > { %v1601_v47 = vmax.f32 %v1575_v32, 0.0  ;;  %v1578_v48 = vadd.f32 %v1577_v50, %v1481_v33  ;;  %1611 = vst [vmem:[%s3031_s9 + $0x30] sm:$0xff] %v1595_v13  ;;  %v1596_v7 = vmax.f32 %v1554_v24, 0.0 }
 0x194   : > { %1619 = vst [vmem:[%s3031_s9 + $0x70] sm:$0xff] %v1603_v16  ;;  %v1604_v36 = vmax.f32 %v1586_v31, 0.0  ;;  %1609 = vst [vmem:[%s3031_s9 + $0x20] sm:$0xff] %v1593_v55  ;;  %v1594_v41 = vmax.f32 %v1546_v26, 0.0 }
 0x195   : > { %1617 = vst [vmem:[%s3031_s9 + $0x60] sm:$0xff] %v1601_v47  ;;  %v1602_v46 = vmax.f32 %v1578_v48, 0.0  ;;  %1612 = vst [vmem:[%s3031_s9 + $0x38] sm:$0xff] %v1596_v7 }
 0x196   : > { %1620 = vst [vmem:[%s3031_s9 + $0x78] sm:$0xff] %v1604_v36  ;;  %1610 = vst [vmem:[%s3031_s9 + $0x28] sm:$0xff] %v1594_v41 }
 0x197   : > { %1618 = vst [vmem:[%s3031_s9 + $0x68] sm:$0xff] %v1602_v46 }
 0x198   : > { %2361 = shalt.err (!%p2358_p6)
}
 0x199   : > { %s2362_s28 = scalar_lea.hbm %s3059_s29, 2048  ;;  %s2366_s10 = scalar_lea.hbm %s3123_s3, 8192 }
 0x19a   : > { %p2363_p7 = scmp.ne.s32.totalorder %s3059_s29, %s2362_s28  ;;  %p2367_p11 = scmp.lt.u32.totalorder %s3059_s29, %s3123_s3 }
 0x19b   : > { %p2368_p12 = scmp.lt.u32.totalorder %s2366_s10, %s2362_s28  ;;  %p2370_p0 = scmp.lt.u32.totalorder %s2362_s28, %s3059_s29 }
 0x19c   : > { %p2364_p9 = pnand %p2363_p7, %p2518_p3 }
 0x19d   : > { %p2369_p13 = por %p2368_p12, %p2367_p11 }
 0x19e   : > { %p2365_p10 = pneg %p2364_p9 }
 0x19f   : > { %p2371_p1 = por %p2370_p0, %p2369_p13 }
 0x1a1   : > { %p2372_p2 = pnand %p2371_p1, %p2365_p10 }
 0x1a3   : > { %2375 = shalt.err (!%p2372_p2)
}
 0x1a4   : > { %s2445_s15 = smov 128   ;;  %s2446_s24 = smov 8  }
 0x1a5   : > { %2183 = dma.vmem_to_hbm [thread:$0]  (%p2518_p3), %s3061_s16, 2048, %s3059_s29, %s3068_s11, %s2445_s15, %s2445_s15, %s2446_s24  }
 0x1a6 PF: > { %p2189_p4 = scmp.ge.s32.totalorder %s2442_s19, 2  ;;  %s1654_s27 = sand.u32 1, %s2414_s12  }
 0x1a7   : > { %s1655_s6 = scalar_lea.sflag [#allocation3], %s1654_s27 }
 0x1a8   : > { %p2186_p5 = pnand %p2189_p4, %p2527_p8 }
 0x1aa   : > { %2409 = dma.done.wait (!%p2186_p5), %s1655_s6, 2048  }
 0x1ab   : > { %2411 = vsyncadd (!%p2186_p5), %s1655_s6, 4294965248  ;;  %s16_s19 = sadd.s32 1, %s2442_s19   ;;  %s3126_s12 = smov %s2418_s13 }
 0x1ac   : > { %p13_p6 = scmp.ge.s32.totalorder %s16_s19, 6   ;;  %s3127_s13 = smov %s2422_s14 }
 0x1ad   : > { %s3128_s14 = smov %s2536_s30  ;;  %s3129_s15 = smov %s2434_s17 }
 0x1ae   : > { %s3130_s16 = smov %s2438_s18  ;;  %s3131_s17 = smov %s3134_s22 }
 0x1af   : > { %s3132_s18 = smov %s3138_s23  ;;  %15 = sbr.rel (!%p13_p6) target bundleno = 5 (0x5), region = 74 }
 0x1b6   :  { %1660 = vsyncpa [#allocation3], 1 }
 0x1b7   :  { %1662 = vsyncpa [#allocation3 + $0x1], 1 }

</bundles_post_ra>
